<compile_context>
chip_gen: v7x
topology: tpu7x:2x2x1
jax: 0.10.0
libtpu: 0.0.40
codegen_flags: <defaults>
</compile_context>

<pallas_src>
import jax
import jax.numpy as jnp
from jax.experimental import pallas as pl
from jax.experimental.pallas import tpu as pltpu

_BN_EPS = 1e-5


def _decoder_kernel(x_ref, w1_ref, w2_ref, w3_ref, vecs_ref, b3_ref, o_ref):
    # x_ref: [B, Dp] bf16; w*_ref: bf16; vecs_ref: [8, Np] f32 packed
    # (rows: b1, g1, be1, b2, g2, be2, pad, pad); b3_ref: [1, Cp] f32.
    inv_b = 1.0 / x_ref.shape[0]          # static python float
    vecs = vecs_ref[...]                  # single load of the packed vectors

    def bn_relu(z, g, b):
        # Training-mode BatchNorm1d: biased batch variance, eps=1e-5.
        # Single pass: issue sum(z) and sum(z*z) together, var = E[z^2]-mean^2.
        s1 = jnp.sum(z, axis=0, keepdims=True)
        s2 = jnp.sum(z * z, axis=0, keepdims=True)
        mean = s1 * inv_b
        var = s2 * inv_b - mean * mean
        h = (z - mean) * jax.lax.rsqrt(var + _BN_EPS)
        return jnp.maximum(h * g + b, 0.0)

    # ---- Linear 1 (bf16 MXU, f32 acc) + BN + ReLU (f32 VPU/EUP) ----
    z = jnp.dot(x_ref[...], w1_ref[...], preferred_element_type=jnp.float32)
    h = bn_relu(z + vecs[0:1, :], vecs[1:2, :], vecs[2:3, :])

    # ---- Linear 2 + BN + ReLU ----
    z = jnp.dot(h.astype(jnp.bfloat16), w2_ref[...],
                preferred_element_type=jnp.float32)
    h = bn_relu(z + vecs[3:4, :], vecs[4:5, :], vecs[5:6, :])

    # ---- Linear 3: logits (lane-dense padded output, sliced in wrapper) ----
    o_ref[...] = (
        jnp.dot(h.astype(jnp.bfloat16), w3_ref[...],
                preferred_element_type=jnp.float32) + b3_ref[...]
    )


def _round_up(n, m):
    return ((n + m - 1) // m) * m


def _pad2(a, rows, cols):
    return jnp.pad(a, ((0, rows - a.shape[0]), (0, cols - a.shape[1])))


def decoder_forward(x, params):
    """x: [B, D_in] float32.  params: dict of weights (see init_decoder_params)."""
    B, d_in = x.shape
    nhid = params["w1"].shape[1]
    ncls = params["w3"].shape[1]

    dp = _round_up(d_in, 128)
    np_ = _round_up(nhid, 128)
    cp = _round_up(ncls, 128)

    # Pad feature dims to 128-lane multiples; cast MXU operands to bf16
    # (halves x / weight DMA bytes; accumulation stays f32 in-kernel).
    xp = _pad2(x, B, dp).astype(jnp.bfloat16)
    w1 = _pad2(params["w1"], dp, np_).astype(jnp.bfloat16)
    w2 = _pad2(params["w2"], np_, np_).astype(jnp.bfloat16)
    w3 = _pad2(params["w3"], np_, cp).astype(jnp.bfloat16)

    # Pack the six tiny per-feature f32 vectors into one [8, Np] array
    # (1 DMA instead of 6); b3 lives in its own [1, Cp] array.
    vecs = jnp.concatenate(
        [params["b1"], params["g1"], params["be1"],
         params["b2"], params["g2"], params["be2"]], axis=0)
    vecs = _pad2(vecs, 8, np_)
    b3 = _pad2(params["b3"], 1, cp)

    # Whole-batch residency is required by training-mode (batch-statistics)
    # BatchNorm; size the scoped VMEM limit explicitly from the shapes so the
    # kernel behaves identically under v5e/v6e/v7x default limits.
    est = (B * (dp + 2 * np_ + cp) * 4          # f32 activations / output
           + B * (dp + 2 * np_) * 2             # bf16 copies fed to the MXU
           + (dp * np_ + np_ * np_ + np_ * cp) * 2   # bf16 weights
           + (8 * np_ + cp) * 4)                # packed vectors
    vmem_limit = int(min(max(2 * est + (4 << 20), 32 << 20), 120 << 20))

    vmem_spec = pl.BlockSpec(memory_space=pltpu.MemorySpace.VMEM)
    args = (xp, w1, w2, w3, vecs, b3)

    out = pl.pallas_call(
        _decoder_kernel,
        out_shape=jax.ShapeDtypeStruct((B, cp), jnp.float32),
        in_specs=[vmem_spec] * len(args),
        out_specs=vmem_spec,
        compiler_params=pltpu.CompilerParams(vmem_limit_bytes=vmem_limit),
    )(*args)
    return out[:, :ncls]


def _xavier_uniform(key, fan_in, fan_out):
    bound = jnp.sqrt(6.0 / (fan_in + fan_out))
    return jax.random.uniform(
        key, (fan_in, fan_out), jnp.float32, minval=-bound, maxval=bound
    )


def init_decoder_params(key, input_shape=256, nhid=192, num_classes=10):
    """Deterministic synthetic init mirroring Decoder.init_weights():
    xavier_uniform_ Linear weights, default (small uniform) Linear biases,
    BatchNorm weight=1, bias=0."""
    k1, k2, k3, kb1, kb2, kb3 = jax.random.split(key, 6)

    def lin_bias(k, fan_in, fan_out):
        bound = 1.0 / jnp.sqrt(float(fan_in))
        return jax.random.uniform(
            k, (1, fan_out), jnp.float32, minval=-bound, maxval=bound
        )

    return {
        "w1": _xavier_uniform(k1, input_shape, nhid),
        "b1": lin_bias(kb1, input_shape, nhid),
        "g1": jnp.ones((1, nhid), jnp.float32),
        "be1": jnp.zeros((1, nhid), jnp.float32),
        "w2": _xavier_uniform(k2, nhid, nhid),
        "b2": lin_bias(kb2, nhid, nhid),
        "g2": jnp.ones((1, nhid), jnp.float32),
        "be2": jnp.zeros((1, nhid), jnp.float32),
        "w3": _xavier_uniform(k3, nhid, num_classes),
        "b3": lin_bias(kb3, nhid, num_classes),
    }


def _reference_forward(x, p):
    """Plain-JAX reference with the same numerics as the kernel
    (bf16 matmul operands, f32 accumulation, batch-stat BN in f32)."""
    def dot_bf16(a, w):
        return jnp.dot(a.astype(jnp.bfloat16), w.astype(jnp.bfloat16),
                       preferred_element_type=jnp.float32)

    def bn(z, g, b):
        mean = jnp.mean(z, axis=0, keepdims=True)
        var = jnp.mean(z * z, axis=0, keepdims=True) - mean * mean
        return (z - mean) * jax.lax.rsqrt(var + _BN_EPS) * g + b

    h = dot_bf16(x, p["w1"]) + p["b1"]
    h = jnp.maximum(bn(h, p["g1"], p["be1"]), 0.0)
    h = dot_bf16(h, p["w2"]) + p["b2"]
    h = jnp.maximum(bn(h, p["g2"], p["be2"]), 0.0)
    return dot_bf16(h, p["w3"]) + p["b3"]


if __name__ == "__main__":
    # Small shapes consistent with Decoder(input_shape, nhid, num_classes)
    B, D_IN, NHID, NUM_CLASSES = 8, 32, 32, 10

    key = jax.random.PRNGKey(0)
    kx, kp = jax.random.split(key)

    x = jax.random.normal(kx, (B, D_IN), jnp.float32)
    params = init_decoder_params(kp, input_shape=D_IN, nhid=NHID,
                                 num_classes=NUM_CLASSES)

    out = jax.block_until_ready(decoder_forward(x, params))
    ref = _reference_forward(x, params)

    assert out.shape == (B, NUM_CLASSES)
    # bf16 MXU operands -> compare against the matched-numerics reference with
    # a tolerance that absorbs reduction-order / bf16-rounding differences.
    assert jnp.allclose(out, ref, atol=2e-2, rtol=2e-2), float(
        jnp.max(jnp.abs(out - ref)))

    print("KERNEL_OK")
</pallas_src>

<mosaic_0001>
module attributes {stable_mosaic.version = 11 : i64} {
  func.func @_decoder_kernel(%arg0: memref<8x128xbf16, #tpu.memory_space<vmem>>, %arg1: memref<128x128xbf16, #tpu.memory_space<vmem>>, %arg2: memref<128x128xbf16, #tpu.memory_space<vmem>>, %arg3: memref<128x128xbf16, #tpu.memory_space<vmem>>, %arg4: memref<8x128xf32, #tpu.memory_space<vmem>>, %arg5: memref<1x128xf32, #tpu.memory_space<vmem>>, %arg6: memref<8x128xf32, #tpu.memory_space<vmem>>) attributes {dimension_semantics = [], scalar_prefetch = 0 : i64, scratch_operands = 0 : i64, tpu.core_type = #tpu.core_type<tc>} {
    %c0 = arith.constant 0 : index
    %c0_0 = arith.constant 0 : index
    %0 = vector.load %arg4[%c0, %c0_0] : memref<8x128xf32, #tpu.memory_space<vmem>>, vector<8x128xf32>
    %c0_1 = arith.constant 0 : index
    %c0_2 = arith.constant 0 : index
    %1 = vector.load %arg0[%c0_1, %c0_2] : memref<8x128xbf16, #tpu.memory_space<vmem>>, vector<8x128xbf16>
    %c0_3 = arith.constant 0 : index
    %c0_4 = arith.constant 0 : index
    %2 = vector.load %arg1[%c0_3, %c0_4] : memref<128x128xbf16, #tpu.memory_space<vmem>>, vector<128x128xbf16>
    %cst = arith.constant dense<0.000000e+00> : vector<8x128xf32>
    %3 = tpu.matmul %1, %2, %cst {dimension_numbers = #tpu.dot_dimension_numbers<[1], [0], [0], [1], [0, 0, 1, 1], [], []>} : vector<8x128xbf16>, vector<128x128xbf16>, vector<8x128xf32> -> vector<8x128xf32>
    %4 = vector.extract_strided_slice %0 {offsets = [0, 0], sizes = [1, 128], strides = [1, 1]} : vector<8x128xf32> to vector<1x128xf32>
    %5 = vector.broadcast %4 : vector<1x128xf32> to vector<8x128xf32>
    %6 = arith.addf %3, %5 : vector<8x128xf32>
    %7 = vector.extract_strided_slice %0 {offsets = [1, 0], sizes = [1, 128], strides = [1, 1]} : vector<8x128xf32> to vector<1x128xf32>
    %8 = vector.extract_strided_slice %0 {offsets = [2, 0], sizes = [1, 128], strides = [1, 1]} : vector<8x128xf32> to vector<1x128xf32>
    %cst_5 = arith.constant dense<0.000000e+00> : vector<128xf32>
    %9 = vector.multi_reduction <add>, %6, %cst_5 [0] : vector<8x128xf32> to vector<128xf32>
    %10 = vector.shape_cast %9 : vector<128xf32> to vector<1x128xf32>
    %11 = arith.mulf %6, %6 : vector<8x128xf32>
    %cst_6 = arith.constant dense<0.000000e+00> : vector<128xf32>
    %12 = vector.multi_reduction <add>, %11, %cst_6 [0] : vector<8x128xf32> to vector<128xf32>
    %13 = vector.shape_cast %12 : vector<128xf32> to vector<1x128xf32>
    %cst_7 = arith.constant 1.250000e-01 : f32
    %14 = vector.broadcast %cst_7 : f32 to vector<1x128xf32>
    %15 = arith.mulf %10, %14 : vector<1x128xf32>
    %cst_8 = arith.constant 1.250000e-01 : f32
    %16 = vector.broadcast %cst_8 : f32 to vector<1x128xf32>
    %17 = arith.mulf %13, %16 : vector<1x128xf32>
    %18 = arith.mulf %15, %15 : vector<1x128xf32>
    %19 = arith.subf %17, %18 : vector<1x128xf32>
    %20 = vector.broadcast %15 : vector<1x128xf32> to vector<8x128xf32>
    %21 = arith.subf %6, %20 : vector<8x128xf32>
    %cst_9 = arith.constant 9.99999974E-6 : f32
    %22 = vector.broadcast %cst_9 : f32 to vector<1x128xf32>
    %23 = arith.addf %19, %22 : vector<1x128xf32>
    %24 = math.rsqrt %23 : vector<1x128xf32>
    %25 = vector.broadcast %24 : vector<1x128xf32> to vector<8x128xf32>
    %26 = arith.mulf %21, %25 : vector<8x128xf32>
    %27 = vector.broadcast %7 : vector<1x128xf32> to vector<8x128xf32>
    %28 = arith.mulf %26, %27 : vector<8x128xf32>
    %29 = vector.broadcast %8 : vector<1x128xf32> to vector<8x128xf32>
    %30 = arith.addf %28, %29 : vector<8x128xf32>
    %cst_10 = arith.constant 0.000000e+00 : f32
    %31 = vector.broadcast %cst_10 : f32 to vector<8x128xf32>
    %32 = arith.maximumf %30, %31 : vector<8x128xf32>
    %33 = arith.truncf %32 : vector<8x128xf32> to vector<8x128xbf16>
    %c0_11 = arith.constant 0 : index
    %c0_12 = arith.constant 0 : index
    %34 = vector.load %arg2[%c0_11, %c0_12] : memref<128x128xbf16, #tpu.memory_space<vmem>>, vector<128x128xbf16>
    %cst_13 = arith.constant dense<0.000000e+00> : vector<8x128xf32>
    %35 = tpu.matmul %33, %34, %cst_13 {dimension_numbers = #tpu.dot_dimension_numbers<[1], [0], [0], [1], [0, 0, 1, 1], [], []>} : vector<8x128xbf16>, vector<128x128xbf16>, vector<8x128xf32> -> vector<8x128xf32>
    %36 = vector.extract_strided_slice %0 {offsets = [3, 0], sizes = [1, 128], strides = [1, 1]} : vector<8x128xf32> to vector<1x128xf32>
    %37 = vector.broadcast %36 : vector<1x128xf32> to vector<8x128xf32>
    %38 = arith.addf %35, %37 : vector<8x128xf32>
    %39 = vector.extract_strided_slice %0 {offsets = [4, 0], sizes = [1, 128], strides = [1, 1]} : vector<8x128xf32> to vector<1x128xf32>
    %40 = vector.extract_strided_slice %0 {offsets = [5, 0], sizes = [1, 128], strides = [1, 1]} : vector<8x128xf32> to vector<1x128xf32>
    %cst_14 = arith.constant dense<0.000000e+00> : vector<128xf32>
    %41 = vector.multi_reduction <add>, %38, %cst_14 [0] : vector<8x128xf32> to vector<128xf32>
    %42 = vector.shape_cast %41 : vector<128xf32> to vector<1x128xf32>
    %43 = arith.mulf %38, %38 : vector<8x128xf32>
    %cst_15 = arith.constant dense<0.000000e+00> : vector<128xf32>
    %44 = vector.multi_reduction <add>, %43, %cst_15 [0] : vector<8x128xf32> to vector<128xf32>
    %45 = vector.shape_cast %44 : vector<128xf32> to vector<1x128xf32>
    %cst_16 = arith.constant 1.250000e-01 : f32
    %46 = vector.broadcast %cst_16 : f32 to vector<1x128xf32>
    %47 = arith.mulf %42, %46 : vector<1x128xf32>
    %cst_17 = arith.constant 1.250000e-01 : f32
    %48 = vector.broadcast %cst_17 : f32 to vector<1x128xf32>
    %49 = arith.mulf %45, %48 : vector<1x128xf32>
    %50 = arith.mulf %47, %47 : vector<1x128xf32>
    %51 = arith.subf %49, %50 : vector<1x128xf32>
    %52 = vector.broadcast %47 : vector<1x128xf32> to vector<8x128xf32>
    %53 = arith.subf %38, %52 : vector<8x128xf32>
    %cst_18 = arith.constant 9.99999974E-6 : f32
    %54 = vector.broadcast %cst_18 : f32 to vector<1x128xf32>
    %55 = arith.addf %51, %54 : vector<1x128xf32>
    %56 = math.rsqrt %55 : vector<1x128xf32>
    %57 = vector.broadcast %56 : vector<1x128xf32> to vector<8x128xf32>
    %58 = arith.mulf %53, %57 : vector<8x128xf32>
    %59 = vector.broadcast %39 : vector<1x128xf32> to vector<8x128xf32>
    %60 = arith.mulf %58, %59 : vector<8x128xf32>
    %61 = vector.broadcast %40 : vector<1x128xf32> to vector<8x128xf32>
    %62 = arith.addf %60, %61 : vector<8x128xf32>
    %cst_19 = arith.constant 0.000000e+00 : f32
    %63 = vector.broadcast %cst_19 : f32 to vector<8x128xf32>
    %64 = arith.maximumf %62, %63 : vector<8x128xf32>
    %65 = arith.truncf %64 : vector<8x128xf32> to vector<8x128xbf16>
    %c0_20 = arith.constant 0 : index
    %c0_21 = arith.constant 0 : index
    %66 = vector.load %arg3[%c0_20, %c0_21] : memref<128x128xbf16, #tpu.memory_space<vmem>>, vector<128x128xbf16>
    %cst_22 = arith.constant dense<0.000000e+00> : vector<8x128xf32>
    %67 = tpu.matmul %65, %66, %cst_22 {dimension_numbers = #tpu.dot_dimension_numbers<[1], [0], [0], [1], [0, 0, 1, 1], [], []>} : vector<8x128xbf16>, vector<128x128xbf16>, vector<8x128xf32> -> vector<8x128xf32>
    %c0_23 = arith.constant 0 : index
    %c0_24 = arith.constant 0 : index
    %68 = vector.load %arg5[%c0_23, %c0_24] : memref<1x128xf32, #tpu.memory_space<vmem>>, vector<1x128xf32>
    %69 = vector.broadcast %68 : vector<1x128xf32> to vector<8x128xf32>
    %70 = arith.addf %67, %69 : vector<8x128xf32>
    %c0_25 = arith.constant 0 : index
    %c0_26 = arith.constant 0 : index
    %71 = vector.load %arg6[%c0_25, %c0_26] : memref<8x128xf32, #tpu.memory_space<vmem>>, vector<8x128xf32>
    tpu.vector_store %arg6[%c0_25, %c0_26], %70 {strides = array<i32>} : memref<8x128xf32, #tpu.memory_space<vmem>>, vector<8x128xf32>,
    return
  }
}

</mosaic_0001>

<bundles_post_ra>
// kernel: tpu_custom_call.1
= control target key start
LH: loop header
LB: loop body
LE: loop exit
PB: predicated region body
PF: predicated region fallthrough
CT: control target
= control target key end

     0   :  { %11 = vsyncpa [#allocation3], 0  ;;  %s923_s0 = inlined_call_operand.hbm [shape: bf16[8,128], index: 0, kind: input, shape index: {}]   ;;  %s924_s1 = inlined_call_operand.hbm [shape: bf16[128,128], index: 1, kind: input, shape index: {}]   ;;  %s925_s2 = inlined_call_operand.hbm [shape: bf16[128,128], index: 2, kind: input, shape index: {}]   ;;  %s926_s3 = inlined_call_operand.hbm [shape: bf16[128,128], index: 3, kind: input, shape index: {}]   ;;  %s927_s4 = inlined_call_operand.vmem [shape: f32[8,128], index: 4, kind: input, shape index: {}]   ;;  %s928_s5 = inlined_call_operand.vmem [shape: f32[1,128], index: 5, kind: input, shape index: {}]   ;;  %s929_s6 = inlined_call_operand.hbm [shape: f32[8,128], index: 6, kind: output, shape index: {}]  }
   0x1   :  { %12 = vsyncpa [#allocation6], 0 }
   0x2   :  { %13 = vsyncpa [#allocation9], 0 }
   0x3   :  { %14 = vsyncpa [#allocation4], 0  ;;  %s758_s21 = smov [#allocation5]   ;;  %s640_s25 = scalar_lea.hbm %s924_s1, 1024 }
   0x4   :  { %s30_s22 = sshll.u32 %s758_s21, 4  ;;  %p641_p0 = scmp.ne.s32.totalorder %s924_s1, %s640_s25  ;;  %s31_s22 = int_to_ptr.vmem [resolvable:$true] %s30_s22 }
   0x5   :  { %p644_p1 = scmp.lt.u32.totalorder %s640_s25, %s924_s1 }
   0x7   :  { %p646_p2 = pnand %p644_p1, %p641_p0 }
   0x9   :  { %649 = shalt.err (!%p646_p2)
}
   0xa   :  { %s650_s30 = scalar_lea.vmem %s31_s22, 1024  ;;  %p655_p4 = scmp.lt.s32.totalorder %s31_s22, %s31_s22 }
   0xb   :  { %p651_p3 = scmp.ne.s32.totalorder %s31_s22, %s650_s30  ;;  %p656_p5 = scmp.lt.s32.totalorder %s650_s30, %s650_s30 }
   0xd   :  { %p657_p6 = por %p656_p5, %p655_p4 }
   0xf   :  { %p658_p7 = pnand %p657_p6, %p651_p3 }
  0x11   :  { %661 = shalt.err (!%p658_p7)
}
  0x12   :  { %s759_s7 = smov 64   ;;  %s760_s8 = smov 4  }
  0x13   :  { %36 = dma.hbm_to_vmem [thread:$0]  %s924_s1, 1024, %s31_s22, [#allocation6], %s759_s7, %s759_s7, %s760_s8  }
  0x14   :  { %s761_s11 = smov [#allocation2]   ;;  %s762_s13 = smov [#allocation7]  }
  0x15   :  { %s21_s12 = sshll.u32 %s761_s11, 4  ;;  %s42_s14 = sshll.u32 %s762_s13, 4  ;;  %s22_s12 = int_to_ptr.vmem [resolvable:$true] %s21_s12  ;;  %s43_s14 = int_to_ptr.vmem [resolvable:$true] %s42_s14 }
  0x16   :  { %s662_s17 = scalar_lea.hbm %s923_s0, 64 }
  0x17   :  { %p663_p8 = scmp.ne.s32.totalorder %s923_s0, %s662_s17  ;;  %p666_p9 = scmp.lt.u32.totalorder %s662_s17, %s923_s0 }
  0x19   :  { %p668_p10 = pnand %p666_p9, %p663_p8 }
  0x1b   :  { %671 = shalt.err (!%p668_p10)
}
  0x1c   :  { %s672_s1 = scalar_lea.vmem %s22_s12, 64  ;;  %p677_p12 = scmp.lt.s32.totalorder %s22_s12, %s22_s12 }
  0x1d   :  { %p673_p11 = scmp.ne.s32.totalorder %s22_s12, %s672_s1  ;;  %p678_p13 = scmp.lt.s32.totalorder %s672_s1, %s672_s1 }
  0x1f   :  { %p679_p0 = por %p678_p13, %p677_p12 }
  0x21   :  { %p680_p1 = pnand %p679_p0, %p673_p11 }
  0x23   :  { %683 = shalt.err (!%p680_p1)
}
  0x24   :  { %24 = dma.hbm_to_vmem [thread:$0]  %s923_s0, 64, %s22_s12, [#allocation3]  }
  0x25   :  { %s684_s26 = scalar_lea.hbm %s925_s2, 1024 }
  0x26   :  { %p685_p2 = scmp.ne.s32.totalorder %s925_s2, %s684_s26  ;;  %p688_p3 = scmp.lt.u32.totalorder %s684_s26, %s925_s2 }
  0x28   :  { %p690_p4 = pnand %p688_p3, %p685_p2 }
  0x2a   :  { %693 = shalt.err (!%p690_p4)
}
  0x2b   :  { %s694_s9 = scalar_lea.vmem %s43_s14, 1024  ;;  %p699_p6 = scmp.lt.s32.totalorder %s43_s14, %s43_s14 }
  0x2c   :  { %p695_p5 = scmp.ne.s32.totalorder %s43_s14, %s694_s9  ;;  %p700_p7 = scmp.lt.s32.totalorder %s694_s9, %s694_s9 }
  0x2e   :  { %p701_p8 = por %p700_p7, %p699_p6 }
  0x30   :  { %p702_p9 = pnand %p701_p8, %p695_p5 }
  0x32   :  { %705 = shalt.err (!%p702_p9)
}
  0x33   :  { %48 = dma.hbm_to_vmem [thread:$0]  %s925_s2, 1024, %s43_s14, [#allocation6], %s759_s7, %s759_s7, %s760_s8  }
  0x34   :  { %s763_s11 = smov [#allocation8]   ;;  %s706_s16 = scalar_lea.hbm %s926_s3, 1024 }
  0x35   :  { %s54_s12 = sshll.u32 %s763_s11, 4  ;;  %p707_p10 = scmp.ne.s32.totalorder %s926_s3, %s706_s16  ;;  %s55_s12 = int_to_ptr.vmem [resolvable:$true] %s54_s12 }
  0x36   :  { %p710_p11 = scmp.lt.u32.totalorder %s706_s16, %s926_s3 }
  0x38   :  { %p712_p12 = pnand %p710_p11, %p707_p10 }
  0x3a   :  { %715 = shalt.err (!%p712_p12)
}
  0x3b   :  { %s716_s21 = scalar_lea.vmem %s55_s12, 1024  ;;  %p721_p0 = scmp.lt.s32.totalorder %s55_s12, %s55_s12 }
  0x3c   :  { %p717_p13 = scmp.ne.s32.totalorder %s55_s12, %s716_s21  ;;  %p722_p1 = scmp.lt.s32.totalorder %s716_s21, %s716_s21 }
  0x3e   :  { %p723_p2 = por %p722_p1, %p721_p0 }
  0x40   :  { %p724_p3 = pnand %p723_p2, %p717_p13 }
  0x42   :  { %727 = shalt.err (!%p724_p3)
}
  0x43   :  { %60 = dma.hbm_to_vmem [thread:$0]  %s926_s3, 1024, %s55_s12, [#allocation9], %s759_s7, %s759_s7, %s760_s8  }
  0x44   :  { %750 = dma.done.wait [#allocation3], 64  }
  0x45   :  { %751 = vsyncadd [#allocation3], 4294967232 }
  0x46   :  { %752 = dma.done.wait [#allocation6], 2048  }
  0x47   :  { %753 = vsyncadd [#allocation6], 4294965248 }
  0x48   :  { %754 = dma.done.wait [#allocation9], 1024  }
  0x49   :  { %755 = vsyncadd [#allocation9], 4294966272  ;;  %v764_v0 = vmov 0.0   ;;  %vm765_vm0 = vmmov 0   ;;  %v612_v1 = vld [vmem:[#allocation5] sm:$0xff]   ;;  %v613_v2 = vld [vmem:[#allocation5 + $0x8] sm:$0xff]   ;;  %v96_v18 = vlaneseq }
  0x4a   :  { %543 = vmatprep.subr.bf16.mxu0 %v764_v0  ;;  %559 = vmatprep.mubr.msk.bf16.mxu0 %vm765_vm0, %v764_v0  ;;  %v614_v3 = vld [vmem:[#allocation5 + $0x10] sm:$0xff]   ;;  %v615_v4 = vld [vmem:[#allocation5 + $0x18] sm:$0xff]   ;;  %v616_v5 = vld [vmem:[#allocation5 + $0x20] sm:$0xff]   ;;  %s766_s1 = smov [#allocation10]  }
  0x4b   :  { %563 = vmatprep.subr.bf16.mxu1 %v764_v0  ;;  %579 = vmatprep.mubr.msk.bf16.mxu1 %vm765_vm0, %v764_v0  ;;  %v617_v6 = vld [vmem:[#allocation5 + $0x28] sm:$0xff]   ;;  %v618_v7 = vld [vmem:[#allocation5 + $0x30] sm:$0xff]   ;;  %v619_v8 = vld [vmem:[#allocation5 + $0x38] sm:$0xff]   ;;  %v882_v19 = vshrl.u32 %v96_v18, 7  ;;  %s480_s22 = sshll.u32 %s766_s1, 4  ;;  %s481_s22 = int_to_ptr.vmem [resolvable:$true] %s480_s22 }
  0x4c   :  { %544 = vmatpush3.bf16.msra.mxu0 %v612_v1  ;;  %v79_v9 = vld [vmem:[#allocation2] sm:$0xf]  ;;  %v620_v10 = vld [vmem:[#allocation7] sm:$0xff]   ;;  %v621_v11 = vld [vmem:[#allocation7 + $0x8] sm:$0xff]   ;;  %s728_s23 = scalar_lea.vmem %s481_s22, 128  ;;  %p733_p5 = scmp.lt.s32.totalorder %s481_s22, %s481_s22 }
  0x4d   :  { %545 = vmatprep.subr.bf16.mxu0 %v764_v0  ;;  %564 = vmatpush3.bf16.msra.mxu1 %v620_v10  ;;  %v622_v12 = vld [vmem:[#allocation7 + $0x10] sm:$0xff]   ;;  %v623_v13 = vld [vmem:[#allocation7 + $0x18] sm:$0xff]   ;;  %v624_v14 = vld [vmem:[#allocation7 + $0x20] sm:$0xff]   ;;  %v98_v20 = vsub.s32 0, %v882_v19  ;;  %v211_v46 = vsub.s32 1, %v882_v19  ;;  %v216_v47 = vsub.s32 2, %v882_v19  ;;  %p729_p4 = scmp.ne.s32.totalorder %s481_s22, %s728_s23  ;;  %p734_p6 = scmp.lt.s32.totalorder %s728_s23, %s728_s23 }
  0x4e   :  { %565 = vmatprep.subr.bf16.mxu1 %v764_v0  ;;  %v625_v15 = vld [vmem:[#allocation7 + $0x28] sm:$0xff]   ;;  %v626_v16 = vld [vmem:[#allocation7 + $0x30] sm:$0xff]   ;;  %v627_v17 = vld [vmem:[#allocation7 + $0x38] sm:$0xff]  }
  0x4f   :  { %v888_v21 = vld [vmem:[%s927_s4] sm:$0xff]  ;;  %v628_v57 = vld [vmem:[#allocation8] sm:$0xff]   ;;  %v629_v58 = vld [vmem:[#allocation8 + $0x8] sm:$0xff]   ;;  %p735_p7 = por %p734_p6, %p733_p5 }
  0x50   :  { %546 = vmatpush3.bf16.msra.mxu0 %v613_v2  ;;  %v99_v22 = vrot.slane %v888_v21, %v98_v20  ;;  %v212_v49 = vrot.slane %v888_v21, %v211_v46  ;;  %v217_v52 = vrot.slane %v888_v21, %v216_v47  ;;  %v630_v59 = vld [vmem:[#allocation8 + $0x10] sm:$0xff]   ;;  %v631_v60 = vld [vmem:[#allocation8 + $0x18] sm:$0xff]   ;;  %v632_v61 = vld [vmem:[#allocation8 + $0x20] sm:$0xff]   ;;  %v239_v2 = vsub.s32 3, %v882_v19 }
  0x51   :  { %547 = vmatprep.subr.bf16.mxu0 %v764_v0  ;;  %566 = vmatpush3.bf16.msra.mxu1 %v621_v11  ;;  %v633_v62 = vld [vmem:[#allocation8 + $0x28] sm:$0xff]   ;;  %v634_v63 = vld [vmem:[#allocation8 + $0x30] sm:$0xff]   ;;  %v635_v1 = vld [vmem:[#allocation8 + $0x38] sm:$0xff]   ;;  %p736_p8 = pnand %p735_p7, %p729_p4 }
  0x52   :  { %567 = vmatprep.subr.bf16.mxu1 %v764_v0 }
  0x54   :  { %548 = vmatpush3.bf16.msra.mxu0 %v614_v3  ;;  %v240_v3 = vrot.slane %v888_v21, %v239_v2 }
  0x55   :  { %549 = vmatprep.subr.bf16.mxu0 %v764_v0  ;;  %568 = vmatpush3.bf16.msra.mxu1 %v622_v12 }
  0x56   :  { %569 = vmatprep.subr.bf16.mxu1 %v764_v0 }
  0x58   :  { %550 = vmatpush3.bf16.msra.mxu0 %v615_v4 }
  0x59   :  { %551 = vmatprep.subr.bf16.mxu0 %v764_v0  ;;  %570 = vmatpush3.bf16.msra.mxu1 %v623_v13 }
  0x5a   :  { %571 = vmatprep.subr.bf16.mxu1 %v764_v0 }
  0x5c   :  { %552 = vmatpush3.bf16.msra.mxu0 %v616_v5 }
  0x5d   :  { %553 = vmatprep.subr.bf16.mxu0 %v764_v0  ;;  %572 = vmatpush3.bf16.msra.mxu1 %v624_v14 }
  0x5e   :  { %573 = vmatprep.subr.bf16.mxu1 %v764_v0 }
  0x60   :  { %554 = vmatpush3.bf16.msra.mxu0 %v617_v6 }
  0x61   :  { %555 = vmatprep.subr.bf16.mxu0 %v764_v0  ;;  %574 = vmatpush3.bf16.msra.mxu1 %v625_v15 }
  0x62   :  { %575 = vmatprep.subr.bf16.mxu1 %v764_v0 }
  0x64   :  { %556 = vmatpush3.bf16.msra.mxu0 %v618_v7 }
  0x65   :  { %557 = vmatprep.subr.bf16.mxu0 %v764_v0  ;;  %576 = vmatpush3.bf16.msra.mxu1 %v626_v16 }
  0x66   :  { %577 = vmatprep.subr.bf16.mxu1 %v764_v0 }
  0x68   :  { %558 = vmatpush3.bf16.msra.mxu0 %v619_v8 }
  0x69   :  { %583 = vmatprep.subr.bf16.mxu0 %v764_v0  ;;  %578 = vmatpush3.bf16.msra.mxu1 %v627_v17 }
  0x6b   :  { %560 = vmatmul.mubr.bf16.vlgmr.msra.gmra.mrb[0].mxu0 %v79_v9 }
  0x6c   :  { %599 = vmatprep.mubr.msk.bf16.mxu0 %vm765_vm0, %v764_v0  ;;  %584 = vmatpush3.bf16.msra.mxu0 %v628_v57 }
  0x6d   :  { %585 = vmatprep.subr.bf16.mxu0 %v764_v0 }
  0x70   :  { %586 = vmatpush3.bf16.msra.mxu0 %v629_v58 }
  0x71   :  { %587 = vmatprep.subr.bf16.mxu0 %v764_v0 }
  0x74   :  { %588 = vmatpush3.bf16.msra.mxu0 %v630_v59 }
  0x75   :  { %589 = vmatprep.subr.bf16.mxu0 %v764_v0 }
  0x78   :  { %590 = vmatpush3.bf16.msra.mxu0 %v631_v60 }
  0x79   :  { %591 = vmatprep.subr.bf16.mxu0 %v764_v0 }
  0x7c   :  { %592 = vmatpush3.bf16.msra.mxu0 %v632_v61 }
  0x7d   :  { %593 = vmatprep.subr.bf16.mxu0 %v764_v0 }
  0x80   :  { %594 = vmatpush3.bf16.msra.mxu0 %v633_v62 }
  0x81   :  { %595 = vmatprep.subr.bf16.mxu0 %v764_v0 }
  0x84   :  { %596 = vmatpush3.bf16.msra.mxu0 %v634_v63 }
  0x85   :  { %597 = vmatprep.subr.bf16.mxu0 %v764_v0 }
  0x88   :  { %598 = vmatpush3.bf16.msra.mxu0 %v635_v1 }
 0x13e   :  { %v182_v23 = vpop.f32.mrb[0].mxu0 }
 0x13f   :  { %v183_v24 = vadd.f32 %v182_v23, %v99_v22  ;;  %v561_v25 = vpop.f32.mrb[1].mxu0 }
 0x140   :  { %v185_v26 = vpop.f32.mrb[2].mxu0 }
 0x141   :  { %v188_v27 = vrot.slane %v183_v24, 4  ;;  %v194_v28 = vmul.f32 %v183_v24, %v183_v24  ;;  %v562_v29 = vpop.f32.mrb[3].mxu0 }
 0x142   :  { %v357_v29 = vsub.s32 5, %v882_v19 }
 0x143   :  { %v189_v30 = vadd.f32 %v188_v27, %v183_v24  ;;  %v195_v31 = vrot.slane %v194_v28, 4 }
 0x145   :  { %v190_v32 = vrot.slane %v189_v30, 2  ;;  %v196_v33 = vadd.f32 %v195_v31, %v194_v28  ;;  %v352_v28 = vsub.s32 4, %v882_v19 }
 0x147   :  { %v191_v34 = vadd.f32 %v190_v32, %v189_v30  ;;  %v197_v35 = vrot.slane %v196_v33, 2  ;;  %v353_v31 = vrot.slane %v888_v21, %v352_v28 }
 0x149   :  { %v192_v36 = vrot.slane %v191_v34, 1  ;;  %v198_v37 = vadd.f32 %v197_v35, %v196_v33 }
 0x14b   :  { %v193_v38 = vadd.f32 %v192_v36, %v191_v34  ;;  %v199_v39 = vrot.slane %v198_v37, 1  ;;  %v358_v34 = vrot.slane %v888_v21, %v357_v29 }
 0x14d   :  { %v200_v40 = vadd.f32 %v199_v39, %v198_v37  ;;  %v201_v41 = vmul.f32 0.125, %v193_v38  ;;  %v507_v39 = vld [vmem:[%s928_s5] ss:$0 sm:$0xff] }
 0x14f   :  { %v202_v42 = vmul.f32 0.125, %v200_v40  ;;  %v203_v43 = vmul.f32 %v201_v41, %v201_v41  ;;  %v205_v48 = vsub.f32 %v183_v24, %v201_v41 }
 0x151   :  { %v204_v44 = vsub.f32 %v202_v42, %v203_v43 }
 0x153   :  { %v206_v45 = vadd.f32 1e-05, %v204_v44 }
 0x155   :  { %636 = vrsqrt.f32 %v206_v45 }
 0x15f   :  { %v637_v50 = vpop.eup %636 }
 0x160   :  { %v208_v51 = vmul.f32 %v637_v50, %v205_v48 }
 0x162   :  { %v213_v53 = vmul.f32 %v212_v49, %v208_v51 }
 0x164   :  { %v218_v54 = vadd.f32 %v217_v52, %v213_v53 }
 0x166   :  { %v219_v55 = vmax.f32 %v218_v54, 0.0 }
 0x168   :  { %v220_v56 = vpack.c.bf16 %v219_v55, %v219_v55 }
 0x16a   :  { %580 = vmatmul.mubr.bf16.vlgmr.msra.gmra.mrb[0].mxu1 %v220_v56 }
 0x23d   :  { %v323_v4 = vpop.f32.mrb[0].mxu1 }
 0x23e   :  { %v324_v5 = vadd.f32 %v323_v4, %v240_v3  ;;  %v581_v6 = vpop.f32.mrb[1].mxu1 }
 0x23f   :  { %v326_v7 = vpop.f32.mrb[2].mxu1 }
 0x240   :  { %v329_v8 = vrot.slane %v324_v5, 4  ;;  %v335_v9 = vmul.f32 %v324_v5, %v324_v5  ;;  %v582_v10 = vpop.f32.mrb[3].mxu1 }
 0x242   :  { %v330_v11 = vadd.f32 %v329_v8, %v324_v5  ;;  %v336_v12 = vrot.slane %v335_v9, 4 }
 0x244   :  { %v331_v13 = vrot.slane %v330_v11, 2  ;;  %v337_v14 = vadd.f32 %v336_v12, %v335_v9 }
 0x246   :  { %v332_v15 = vadd.f32 %v331_v13, %v330_v11  ;;  %v338_v16 = vrot.slane %v337_v14, 2 }
 0x248   :  { %v333_v17 = vrot.slane %v332_v15, 1  ;;  %v339_v0 = vadd.f32 %v338_v16, %v337_v14 }
 0x24a   :  { %v334_v18 = vadd.f32 %v333_v17, %v332_v15  ;;  %v340_v20 = vrot.slane %v339_v0, 1 }
 0x24c   :  { %v341_v22 = vadd.f32 %v340_v20, %v339_v0  ;;  %v342_v23 = vmul.f32 0.125, %v334_v18 }
 0x24e   :  { %v343_v24 = vmul.f32 0.125, %v341_v22  ;;  %v344_v25 = vmul.f32 %v342_v23, %v342_v23  ;;  %v346_v30 = vsub.f32 %v324_v5, %v342_v23 }
 0x250   :  { %v345_v26 = vsub.f32 %v343_v24, %v344_v25 }
 0x252   :  { %v347_v27 = vadd.f32 1e-05, %v345_v26 }
 0x254   :  { %638 = vrsqrt.f32 %v347_v27 }
 0x25e   :  { %v639_v32 = vpop.eup %638 }
 0x25f   :  { %v349_v33 = vmul.f32 %v639_v32, %v346_v30 }
 0x261   :  { %v354_v35 = vmul.f32 %v353_v31, %v349_v33 }
 0x263   :  { %v359_v36 = vadd.f32 %v358_v34, %v354_v35 }
 0x265   :  { %v360_v37 = vmax.f32 %v359_v36, 0.0 }
 0x267   :  { %v361_v38 = vpack.c.bf16 %v360_v37, %v360_v37 }
 0x269   :  { %600 = vmatmul.mubr.bf16.vlgmr.msra.gmra.mrb[4].mxu0 %v361_v38 }
 0x33c   :  { %v467_v40 = vpop.f32.mrb[4].mxu0 }
 0x33d   :  { %v468_v19 = vadd.f32 %v507_v39, %v467_v40  ;;  %v601_v41 = vpop.f32.mrb[5].mxu0 }
 0x33e   :  { %v470_v42 = vpop.f32.mrb[6].mxu0 }
 0x33f   :  { %473 = vst [vmem:[#allocation10] sm:$0xff] %v468_v19  ;;  %v602_v43 = vpop.f32.mrb[7].mxu0 }
 0x340   :  { %739 = shalt.err (!%p736_p8)
}
 0x341   :  { %s740_s5 = scalar_lea.hbm %s929_s6, 128 }
 0x342   :  { %p741_p9 = scmp.ne.s32.totalorder %s929_s6, %s740_s5  ;;  %p744_p10 = scmp.lt.u32.totalorder %s740_s5, %s929_s6 }
 0x344   :  { %p746_p11 = pnand %p744_p10, %p741_p9 }
 0x346   :  { %749 = shalt.err (!%p746_p11)
}
 0x347   :  { %483 = dma.vmem_to_hbm [thread:$0]  %s481_s22, 128, %s929_s6, [#allocation4]  }
 0x348   :  { %756 = dma.done.wait [#allocation4], 128  }
 0x349   :  { %757 = vsyncadd [#allocation4], 4294967168 }
 0x34a   :  { %487 = vsyncpa [#allocation3], 1 }
 0x34b   :  { %488 = vsyncpa [#allocation6], 1 }
 0x34c   :  { %489 = vsyncpa [#allocation9], 1 }
 0x34d   :  { %490 = vsyncpa [#allocation4], 1 }

</bundles_post_ra>
